<compile_context>
chip_gen: v6e
topology: v6e:2x2x1
jax: 0.10.0
libtpu: 0.0.40
codegen_flags: <defaults>
</compile_context>

<pallas_src>
import functools

import numpy as np
import jax
import jax.numpy as jnp
from jax.experimental import pallas as pl
from jax.experimental.pallas import tpu as pltpu


def _tv_kernel(x_ref, masks_ref, h_ref, w_ref, *, W, use_roll):
    """x_ref: (T, L) block of flattened images (L = H*W).
    masks_ref: (2, L) f32; row 0 = vertical-diff validity mask (j < L-W),
               row 1 = horizontal-diff validity mask (j % W != W-1).
    h_ref / w_ref: (1, 8, 128) per-block partial-sum output tiles."""
    x = x_ref[...]
    L = x.shape[-1]

    if use_roll:
        # Lane rotations go through the XLU; no (T, L) slice copies.
        # pltpu.roll == jnp.roll: out[j] = x[(j - shift) % L], so shift = L - W
        # gives out[j] = x[(j + W) % L].
        xh = pltpu.roll(x, shift=L - W, axis=1)
        dh = (xh - x).astype(jnp.float32) * masks_ref[0:1, :]
        h_ref[...] = jnp.full(h_ref.shape, jnp.sum(dh * dh), dtype=jnp.float32)

        xw = pltpu.roll(x, shift=L - 1, axis=1)
        dw = (xw - x).astype(jnp.float32) * masks_ref[1:2, :]
        w_ref[...] = jnp.full(w_ref.shape, jnp.sum(dw * dw), dtype=jnp.float32)
    else:
        # Fallback for L not a multiple of 128 (lane-unaligned but correct).
        dh = (x[:, W:] - x[:, : L - W]).astype(jnp.float32)
        h_ref[...] = jnp.full(h_ref.shape, jnp.sum(dh * dh), dtype=jnp.float32)

        dw = (x[:, 1:] - x[:, : L - 1]).astype(jnp.float32) * masks_ref[1:2, : L - 1]
        w_ref[...] = jnp.full(w_ref.shape, jnp.sum(dw * dw), dtype=jnp.float32)


def _pick_tile_rows(N, L, itemsize, vmem_limit_bytes):
    """Pick the per-step row-block size T (and any tail padding rows).

    T must be a multiple of 8 (sublane alignment of the (T, L) block) or equal
    N. Prefer a T that divides N exactly so no host-side pad is needed."""
    # Rough per-row VMEM working set: double-buffered input block + one rolled
    # copy + f32 diff temporaries.
    per_row = L * (3 * itemsize + 12)
    budget = (2 * vmem_limit_bytes) // 3
    vmem_rows = max(8, budget // per_row)      # VMEM-limited row count
    target = vmem_rows
    if N >= 16:
        # Keep >= 2 grid steps: the grid axis is "parallel", so v7x can shard
        # steps across its 2 TensorCores.
        target = min(target, max(8, ((N // 2) // 8) * 8))
    if N <= target:
        return N, 0                            # single block (block dim == array dim)
    best = 0
    t = 8
    while t <= target:
        if N % t == 0:
            best = t
        t += 8
    if best:
        return best, 0                         # sublane-aligned exact divisor, no pad
    if N <= vmem_rows:
        return N, 0                            # no nice divisor but still fits: 1 block
    # TODO(synk): mask tail rows in-kernel instead of padding for huge N with
    # awkward factorizations; zero-row padding keeps correctness meanwhile.
    T = max(8, (target // 8) * 8)
    return T, (-N) % T


def tv_loss(x, tv_loss_weight=1.0):
    """Pallas implementation of Deep3DStabilizer TVLoss.forward.

    x: (B, C, H, W) float array (NCHW, like the PyTorch module).
    Returns scalar float32 loss.
    """
    B, C, H, W = x.shape
    N = B * C
    L = H * W
    xf = x.reshape(N, L)  # contiguous reshape: lane-dense rows, no data movement

    # Generation-aware VMEM budget (v5e/v6e: 128 MiB physical, v7x: 64 MiB).
    try:
        info = pltpu.get_tpu_info()
        vmem_cap = int(getattr(info, "vmem_capacity_bytes", 64 * 1024 * 1024))
    except Exception:
        vmem_cap = 64 * 1024 * 1024
    vmem_limit = max(16 * 1024 * 1024, min(vmem_cap // 2, 64 * 1024 * 1024))

    T, pad_rows = _pick_tile_rows(N, L, x.dtype.itemsize, vmem_limit)
    if pad_rows:
        xf = jnp.pad(xf, ((0, pad_rows), (0, 0)))  # zero rows contribute nothing
    G = (N + pad_rows) // T

    # Full-length lane-aligned validity masks (row 0: vertical, row 1: horizontal).
    col = np.arange(L)
    masks = jnp.asarray(
        np.stack([
            (col < L - W).astype(np.float32),
            (col % W != (W - 1)).astype(np.float32),
        ])
    )  # (2, L)

    use_roll = (L % 128 == 0) and L > 0

    h_parts, w_parts = pl.pallas_call(
        functools.partial(_tv_kernel, W=W, use_roll=use_roll),
        grid=(G,),
        in_specs=[
            pl.BlockSpec((T, L), lambda i: (i, 0)),
            pl.BlockSpec((2, L), lambda i: (0, 0)),
        ],
        out_specs=[
            pl.BlockSpec((1, 8, 128), lambda i: (i, 0, 0)),
            pl.BlockSpec((1, 8, 128), lambda i: (i, 0, 0)),
        ],
        out_shape=[
            jax.ShapeDtypeStruct((G, 8, 128), jnp.float32),
            jax.ShapeDtypeStruct((G, 8, 128), jnp.float32),
        ],
        compiler_params=pltpu.CompilerParams(
            dimension_semantics=("parallel",),   # independent blocks: v7x dual-TC OK
            vmem_limit_bytes=int(vmem_limit),
        ),
    )(xf, masks)

    h_tv = jnp.sum(h_parts[:, 0, 0])
    w_tv = jnp.sum(w_parts[:, 0, 0])

    count_h = C * (H - 1) * W   # _tensor_size(x[:, :, 1:, :])
    count_w = C * H * (W - 1)   # _tensor_size(x[:, :, :, 1:])

    return (
        jnp.float32(tv_loss_weight)
        * 2.0
        * (h_tv / count_h + w_tv / count_w)
        / B
    )


def _tv_loss_ref(x, tv_loss_weight=1.0):
    """Plain-JAX reference mirroring the PyTorch module exactly."""
    B, C, H, W = x.shape
    count_h = C * (H - 1) * W
    count_w = C * H * (W - 1)
    h_tv = jnp.sum((x[:, :, 1:, :] - x[:, :, : H - 1, :]) ** 2)
    w_tv = jnp.sum((x[:, :, :, 1:] - x[:, :, :, : W - 1]) ** 2)
    return tv_loss_weight * 2.0 * (h_tv / count_h + w_tv / count_w) / B


if __name__ == "__main__":
    # TVLoss has no learned parameters; TVLoss_weight=1 (deterministic init).
    TVLOSS_WEIGHT = 1.0

    key = jax.random.PRNGKey(0)

    # Main test: L = 256 (multiple of 128) exercises the pltpu.roll fast path.
    x = jax.random.normal(key, (2, 4, 16, 16), dtype=jnp.float32)
    out = jax.block_until_ready(tv_loss(x, TVLOSS_WEIGHT))
    ref = _tv_loss_ref(x, TVLOSS_WEIGHT)
    assert jnp.allclose(out, ref, rtol=1e-5, atol=1e-5), (out, ref)

    # Secondary test: L = 120 (not a multiple of 128) exercises the fallback path.
    x2 = jax.random.normal(jax.random.PRNGKey(1), (1, 3, 12, 10), dtype=jnp.float32)
    out2 = jax.block_until_ready(tv_loss(x2, TVLOSS_WEIGHT))
    ref2 = _tv_loss_ref(x2, TVLOSS_WEIGHT)
    assert jnp.allclose(out2, ref2, rtol=1e-5, atol=1e-5), (out2, ref2)

    print("KERNEL_OK")
</pallas_src>

<mosaic_0001>
module attributes {stable_mosaic.version = 11 : i64} {
  func.func @_tv_kernel(%arg0: i32, %arg1: memref<8x256xf32, #tpu.memory_space<vmem>>, %arg2: memref<2x256xf32, #tpu.memory_space<vmem>>, %arg3: memref<1x8x128xf32, #tpu.memory_space<vmem>>, %arg4: memref<1x8x128xf32, #tpu.memory_space<vmem>>) attributes {dimension_semantics = [#tpu.dimension_semantics<parallel>], iteration_bounds = array<i64: 1>, scalar_prefetch = 0 : i64, scratch_operands = 0 : i64, tpu.core_type = #tpu.core_type<tc>, window_params = [{transform_indices = @transform_0, window_bounds = array<i64: 8, 256>}, {pipeline_mode = #tpu.pipeline_mode<synchronous>, transform_indices = @transform_1, window_bounds = array<i64: 2, 256>}, {transform_indices = @transform_2, window_bounds = array<i64: 1, 8, 128>}, {transform_indices = @transform_3, window_bounds = array<i64: 1, 8, 128>}]} {
    %c0 = arith.constant 0 : index
    %c0_0 = arith.constant 0 : index
    %0 = vector.load %arg1[%c0, %c0_0] : memref<8x256xf32, #tpu.memory_space<vmem>>, vector<8x256xf32>
    %c240_i32 = arith.constant 240 : i32
    %1 = tpu.dynamic_rotate %0 by %c240_i32 dim 1 : vector<8x256xf32>, i32 -> vector<8x256xf32>
    %2 = arith.subf %1, %0 : vector<8x256xf32>
    %c0_1 = arith.constant 0 : index
    %c0_2 = arith.constant 0 : index
    %3 = vector.load %arg2[%c0_1, %c0_2] : memref<2x256xf32, #tpu.memory_space<vmem>>, vector<1x256xf32>
    %4 = vector.broadcast %3 : vector<1x256xf32> to vector<8x256xf32>
    %5 = arith.mulf %2, %4 : vector<8x256xf32>
    %6 = arith.mulf %5, %5 : vector<8x256xf32>
    %7 = vector.shape_cast %6 : vector<8x256xf32> to vector<1x8x256xf32>
    %cst = arith.constant dense<0.000000e+00> : vector<1xf32>
    %8 = vector.multi_reduction <add>, %7, %cst [1, 2] : vector<1x8x256xf32> to vector<1xf32>
    %9 = vector.shape_cast %8 : vector<1xf32> to vector<1x1x1xf32>
    %10 = vector.extract %9[0, 0, 0] : f32 from vector<1x1x1xf32>
    %11 = vector.broadcast %10 : f32 to vector<1x8x128xf32>
    %c0_3 = arith.constant 0 : index
    %c0_4 = arith.constant 0 : index
    %c0_5 = arith.constant 0 : index
    %12 = vector.load %arg3[%c0_3, %c0_4, %c0_5] : memref<1x8x128xf32, #tpu.memory_space<vmem>>, vector<1x8x128xf32>
    tpu.vector_store %arg3[%c0_3, %c0_4, %c0_5], %11 {strides = array<i32>} : memref<1x8x128xf32, #tpu.memory_space<vmem>>, vector<1x8x128xf32>,
    %c255_i32 = arith.constant 255 : i32
    %13 = tpu.dynamic_rotate %0 by %c255_i32 dim 1 : vector<8x256xf32>, i32 -> vector<8x256xf32>
    %14 = arith.subf %13, %0 : vector<8x256xf32>
    %c1 = arith.constant 1 : index
    %c0_6 = arith.constant 0 : index
    %15 = vector.load %arg2[%c1, %c0_6] : memref<2x256xf32, #tpu.memory_space<vmem>>, vector<1x256xf32>
    %16 = vector.broadcast %15 : vector<1x256xf32> to vector<8x256xf32>
    %17 = arith.mulf %14, %16 : vector<8x256xf32>
    %18 = arith.mulf %17, %17 : vector<8x256xf32>
    %19 = vector.shape_cast %18 : vector<8x256xf32> to vector<1x8x256xf32>
    %cst_7 = arith.constant dense<0.000000e+00> : vector<1xf32>
    %20 = vector.multi_reduction <add>, %19, %cst_7 [1, 2] : vector<1x8x256xf32> to vector<1xf32>
    %21 = vector.shape_cast %20 : vector<1xf32> to vector<1x1x1xf32>
    %22 = vector.extract %21[0, 0, 0] : f32 from vector<1x1x1xf32>
    %23 = vector.broadcast %22 : f32 to vector<1x8x128xf32>
    %c0_8 = arith.constant 0 : index
    %c0_9 = arith.constant 0 : index
    %c0_10 = arith.constant 0 : index
    %24 = vector.load %arg4[%c0_8, %c0_9, %c0_10] : memref<1x8x128xf32, #tpu.memory_space<vmem>>, vector<1x8x128xf32>
    tpu.vector_store %arg4[%c0_8, %c0_9, %c0_10], %23 {strides = array<i32>} : memref<1x8x128xf32, #tpu.memory_space<vmem>>, vector<1x8x128xf32>,
    return
  }
  func.func @transform_0(%arg0: i32) -> (i32, i32) {
    %c0_i32 = arith.constant 0 : i32
    %c0_i32_0 = arith.constant 0 : i32
    return %arg0, %c0_i32 : i32, i32
  }
  func.func @transform_1(%arg0: i32) -> (i32, i32) {
    %c0_i32 = arith.constant 0 : i32
    %c0_i32_0 = arith.constant 0 : i32
    %c0_i32_1 = arith.constant 0 : i32
    return %c0_i32, %c0_i32_0 : i32, i32
  }
  func.func @transform_2(%arg0: i32) -> (i32, i32, i32) {
    %c0_i32 = arith.constant 0 : i32
    %c0_i32_0 = arith.constant 0 : i32
    %c0_i32_1 = arith.constant 0 : i32
    return %arg0, %c0_i32, %c0_i32_0 : i32, i32, i32
  }
  func.func @transform_3(%arg0: i32) -> (i32, i32, i32) {
    %c0_i32 = arith.constant 0 : i32
    %c0_i32_0 = arith.constant 0 : i32
    %c0_i32_1 = arith.constant 0 : i32
    return %arg0, %c0_i32, %c0_i32_0 : i32, i32, i32
  }
}

</mosaic_0001>

<bundles_post_ra>
// kernel: tpu_custom_call.1
= control target key start
LH: loop header
LB: loop body
LE: loop exit
PB: predicated region body
PF: predicated region fallthrough
CT: control target
= control target key end

     0   :  { %9 = vsyncpa [#allocation3], 0  ;;  %s284_s0 = inlined_call_operand.hbm [shape: f32[8,256], index: 0, kind: input, shape index: {}]   ;;  %s285_s1 = inlined_call_operand.hbm [shape: f32[2,256], index: 1, kind: input, shape index: {}]   ;;  %s286_s2 = inlined_call_operand.hbm [shape: f32[1,8,128], index: 2, kind: output, shape index: {0}]   ;;  %s287_s3 = inlined_call_operand.hbm [shape: f32[1,8,128], index: 3, kind: output, shape index: {1}]  }
   0x1   :  { %10 = vsyncpa [#allocation6], 0 }
   0x2   :  { %11 = vsyncpa [#allocation4], 0 }
   0x3   :  { %12 = vsyncpa [#allocation9], 0  ;;  %s246_s12 = smov [#allocation2]   ;;  %s247_s14 = smov [#allocation5]  }
   0x4   :  { %s19_s13 = sshll.u32 %s246_s12, 4  ;;  %s29_s15 = sshll.u32 %s247_s14, 4  ;;  %s20_s13 = int_to_ptr.vmem [resolvable:$true] %s19_s13  ;;  %s30_s15 = int_to_ptr.vmem [resolvable:$true] %s29_s15 }
   0x5   :  { %s166_s16 = scalar_lea.vmem %s20_s13, 256  ;;  %p171_p1 = scmp.lt.s32.totalorder %s20_s13, %s20_s13 }
   0x6   :  { %p167_p0 = scmp.ne.s32.totalorder %s20_s13, %s166_s16  ;;  %p172_p2 = scmp.lt.s32.totalorder %s166_s16, %s166_s16 }
   0x8   :  { %p173_p3 = por %p172_p2, %p171_p1 }
   0xa   :  { %p174_p4 = pnand %p173_p3, %p167_p0 }
   0xc   :  { %177 = shalt.err (!%p174_p4)
}
   0xd   :  { %22 = dma.hbm_to_vmem [thread:$0]  %s284_s0, 256, %s20_s13, [#allocation3]  }
   0xe   :  { %s186_s19 = scalar_lea.vmem %s30_s15, 64  ;;  %p191_p6 = scmp.lt.s32.totalorder %s30_s15, %s30_s15 }
   0xf   :  { %p187_p5 = scmp.ne.s32.totalorder %s30_s15, %s186_s19  ;;  %p192_p7 = scmp.lt.s32.totalorder %s186_s19, %s186_s19 }
  0x11   :  { %p193_p8 = por %p192_p7, %p191_p6 }
  0x13   :  { %p194_p9 = pnand %p193_p8, %p187_p5 }
  0x15   :  { %197 = shalt.err (!%p194_p9)
}
  0x16   :  { %32 = dma.hbm_to_vmem [thread:$0]  %s285_s1, 64, %s30_s15, [#allocation6]  }
  0x17   :  { %238 = dma.done.wait [#allocation3], 256  }
  0x18   :  { %239 = vsyncadd [#allocation3], 4294967040 }
  0x19   :  { %240 = dma.done.wait [#allocation6], 64  }
  0x1a   :  { %241 = vsyncadd [#allocation6], 4294967232  ;;  %v39_v0 = vld [vmem:[#allocation2] sm:$0xff]  ;;  %s248_s22 = smov 127   ;;  %s249_s23 = smov 112   ;;  %v40_v1 = vld [vmem:[#allocation2 + $0x8] sm:$0xff]  ;;  %v45_v2 = vlaneseq }
  0x1b   :  { %80 = vrot.lane.b32.xlu1 %v39_v0, %s248_s22  ;;  %41 = vrot.lane.b32.xlu0 %v39_v0, %s249_s23  ;;  %v90_v9 = vld [vmem:[#allocation5 + $0x1] ss:$2 sm:$0x3]  ;;  %v52_v10 = vld [vmem:[#allocation5] ss:$2 sm:$0x3] }
  0x1c   :  { %v55_v3 = vshrl.u32 %v45_v2, 7  ;;  %v46_v4 = vand.u32 127, %v45_v2  ;;  %s250_s0 = smov [#allocation7]   ;;  %s251_s24 = smov [#allocation8]  }
  0x1d   :  { %s124_s1 = sshll.u32 %s250_s0, 4  ;;  %s134_s25 = sshll.u32 %s251_s24, 4  ;;  %s125_s1 = int_to_ptr.vmem [resolvable:$true] %s124_s1  ;;  %s135_s25 = int_to_ptr.vmem [resolvable:$true] %s134_s25 }
  0x1e   :  { %v56_v7 = vsub.s32 0, %v55_v3  ;;  %v60_v8 = vsub.s32 1, %v55_v3  ;;  %vm84_vm0 = vcmp.lt.s32.totalorder %v46_v4, 127  ;;  %vm47_vm1 = vcmp.lt.s32.totalorder %v46_v4, 112  ;;  %s198_s28 = scalar_lea.vmem %s125_s1, 128  ;;  %p203_p11 = scmp.lt.s32.totalorder %s125_s1, %s125_s1 }
  0x1f   :  { %82 = vrot.lane.b32.xlu1 %v40_v1, %s248_s22  ;;  %43 = vrot.lane.b32.xlu0 %v40_v1, %s249_s23  ;;  %p199_p10 = scmp.ne.s32.totalorder %s125_s1, %s198_s28  ;;  %p204_p12 = scmp.lt.s32.totalorder %s198_s28, %s198_s28 }
  0x20   :  { %v95_v13 = vrot.slane %v90_v9, %v56_v7  ;;  %v99_v14 = vrot.slane %v90_v9, %v60_v8  ;;  %v57_v15 = vrot.slane %v52_v10, %v56_v7  ;;  %v61_v16 = vrot.slane %v52_v10, %v60_v8 }
  0x21   :  { %p205_p13 = por %p204_p12, %p203_p11 }
  0x23   :  { %p206_p0 = pnand %p205_p13, %p199_p10 }
  0x8d   :  { %v81_v5 = vpop.permute.xlu1 %80  ;;  %v42_v6 = vpop.permute.xlu0 %41 }
  0x91   :  { %v83_v11 = vpop.permute.xlu1 %82  ;;  %v44_v12 = vpop.permute.xlu0 %43 }
  0x92   :  { %v85_v17 = vsel %vm84_vm0, %v81_v5, %v83_v11  ;;  %v86_v18 = vsel %vm84_vm0, %v83_v11, %v81_v5  ;;  %v48_v19 = vsel %vm47_vm1, %v42_v6, %v44_v12  ;;  %v49_v20 = vsel %vm47_vm1, %v44_v12, %v42_v6 }
  0x93   :  { %v87_v21 = vsub.f32 %v85_v17, %v39_v0  ;;  %v88_v22 = vsub.f32 %v86_v18, %v40_v1  ;;  %v50_v23 = vsub.f32 %v48_v19, %v39_v0  ;;  %v51_v24 = vsub.f32 %v49_v20, %v40_v1 }
  0x95   :  { %v102_v25 = vmul.f32 %v95_v13, %v87_v21  ;;  %v103_v26 = vmul.f32 %v99_v14, %v88_v22  ;;  %v64_v27 = vmul.f32 %v57_v15, %v50_v23  ;;  %v65_v28 = vmul.f32 %v61_v16, %v51_v24 }
  0x97   :  { %v104_v29 = vmul.f32 %v102_v25, %v102_v25  ;;  %v105_v30 = vmul.f32 %v103_v26, %v103_v26  ;;  %v66_v31 = vmul.f32 %v64_v27, %v64_v27  ;;  %v67_v32 = vmul.f32 %v65_v28, %v65_v28 }
  0x99   :  { %v106_v33 = vadd.f32 %v105_v30, %v104_v29  ;;  %v68_v34 = vadd.f32 %v67_v32, %v66_v31 }
  0x9b   :  { %107 = vadd.xlane.f32.xlu1 %v106_v33  ;;  %69 = vadd.xlane.f32.xlu0 %v68_v34 }
 0x124   :  { %v108_v35 = vpop.xlane.xlu1 %107  ;;  %v70_v36 = vpop.xlane.xlu0 %69 }
 0x125   :  { %v109_v37 = vrot.slane %v108_v35, 4  ;;  %v71_v38 = vrot.slane %v70_v36, 4 }
 0x127   :  { %v110_v39 = vadd.f32 %v109_v37, %v108_v35  ;;  %v72_v40 = vadd.f32 %v71_v38, %v70_v36 }
 0x129   :  { %v111_v41 = vrot.slane %v110_v39, 2  ;;  %v73_v42 = vrot.slane %v72_v40, 2 }
 0x12b   :  { %v112_v43 = vadd.f32 %v111_v41, %v110_v39  ;;  %v74_v44 = vadd.f32 %v73_v42, %v72_v40 }
 0x12d   :  { %v75_v45 = vrot.slane %v74_v44, 1  ;;  %v113_v46 = vrot.slane %v112_v43, 1 }
 0x12f   :  { %v76_v47 = vadd.f32 %v75_v45, %v74_v44  ;;  %v114_v48 = vadd.f32 %v113_v46, %v112_v43 }
 0x131   :  { %148 = vpush %v76_v47 }
 0x132   :  { %150 = vpush %v114_v48 }
 0x162   :  { %s149_s26 = spop %148 }
 0x163   :  { %v78_v49 = vstv %s149_s26  ;;  %s151_s27 = spop %150 }
 0x164   :  { %79 = vst [vmem:[#allocation7] sm:$0xff] %v78_v49  ;;  %v116_v50 = vstv %s151_s27 }
 0x165   :  { %117 = vst [vmem:[#allocation8] sm:$0xff] %v116_v50 }
 0x166   :  { %209 = shalt.err (!%p206_p0)
}
 0x167   :  { %127 = dma.vmem_to_hbm [thread:$0]  %s125_s1, 128, %s286_s2, [#allocation4]  }
 0x168   :  { %s218_s4 = scalar_lea.vmem %s135_s25, 128  ;;  %p223_p2 = scmp.lt.s32.totalorder %s135_s25, %s135_s25 }
 0x169   :  { %p219_p1 = scmp.ne.s32.totalorder %s135_s25, %s218_s4  ;;  %p224_p3 = scmp.lt.s32.totalorder %s218_s4, %s218_s4 }
 0x16b   :  { %p225_p4 = por %p224_p3, %p223_p2 }
 0x16d   :  { %p226_p5 = pnand %p225_p4, %p219_p1 }
 0x16f   :  { %229 = shalt.err (!%p226_p5)
}
 0x170   :  { %137 = dma.vmem_to_hbm [thread:$0]  %s135_s25, 128, %s287_s3, [#allocation9]  }
 0x171   :  { %242 = dma.done.wait [#allocation4], 128  }
 0x172   :  { %243 = vsyncadd [#allocation4], 4294967168 }
 0x173   :  { %244 = dma.done.wait [#allocation9], 128  }
 0x174   :  { %245 = vsyncadd [#allocation9], 4294967168 }
 0x175   :  { %144 = vsyncpa [#allocation3], 1 }
 0x176   :  { %145 = vsyncpa [#allocation6], 1 }
 0x177   :  { %146 = vsyncpa [#allocation4], 1 }
 0x178   :  { %147 = vsyncpa [#allocation9], 1 }

</bundles_post_ra>
